<compile_context>
chip_gen: v7x
topology: tpu7x:2x2x1
jax: 0.10.0
libtpu: 0.0.40
codegen_flags: <defaults>
</compile_context>

<pallas_src>
import math

import jax
import jax.numpy as jnp
from jax.experimental import pallas as pl
from jax.experimental.pallas import tpu as pltpu

LANES = 128
P_CHUNKS = 2  # leading "parallel" grid axis (maps to v7x's 2 TensorCores)

# Normalized alphas baked at trace time (no device op, no SMEM operand).
_ALPHA_RAW = (0.5, 0.7, 1.0)
_ALPHA_NORM = math.sqrt(sum(a * a for a in _ALPHA_RAW))
A0 = _ALPHA_RAW[0] / _ALPHA_NORM
A1 = _ALPHA_RAW[1] / _ALPHA_NORM
A2 = _ALPHA_RAW[2] / _ALPHA_NORM


def _smooth_l1_elem(pred_f32, target_f32):
    """Element-wise SmoothL1 (beta=1.0), no reduction."""
    d = pred_f32 - target_f32
    ad = jnp.abs(d)
    return jnp.where(ad < 1.0, 0.5 * d * d, ad - 0.5)


def _make_tuple_kernel(a0, a12, scale):
    """Tuple path: loss = a0*SL1(c1,t) + a12*SL1(c2,t).  c3 is never loaded."""

    def kernel(c1_ref, c2_ref, t_ref, out_ref, acc_ref):
        step = pl.program_id(1)

        @pl.when(step == 0)
        def _init():
            acc_ref[...] = jnp.zeros_like(acc_ref)

        t = t_ref[...].astype(jnp.float32)          # one cast per tensor per tile
        e1 = _smooth_l1_elem(c1_ref[...].astype(jnp.float32), t)
        e2 = _smooth_l1_elem(c2_ref[...].astype(jnp.float32), t)
        # c2 term computed once; alpha1+alpha2 folded at trace time (a12).
        w = a0 * e1 + a12 * e2
        acc_ref[...] += jnp.sum(w, axis=0, keepdims=True)   # (1, LANES) partial

        @pl.when(step == pl.num_programs(1) - 1)
        def _finalize():
            # scale = 1 / (8 * n_elems): broadcast of acc/8 across 8 sublanes
            # keeps the output block (8,128)-tiled while jnp.sum(out) in the
            # wrapper still yields the correct total.
            part = (acc_ref[...] * scale)[:, None, :]        # (1, 1, LANES)
            out_ref[...] = jnp.broadcast_to(part, (1, 8, LANES))

    return kernel


def _make_single_kernel(scale):
    """Single-prediction path: loss = SL1(x, t)."""

    def kernel(x_ref, t_ref, out_ref, acc_ref):
        step = pl.program_id(1)

        @pl.when(step == 0)
        def _init():
            acc_ref[...] = jnp.zeros_like(acc_ref)

        t = t_ref[...].astype(jnp.float32)
        w = _smooth_l1_elem(x_ref[...].astype(jnp.float32), t)
        acc_ref[...] += jnp.sum(w, axis=0, keepdims=True)

        @pl.when(step == pl.num_programs(1) - 1)
        def _finalize():
            part = (acc_ref[...] * scale)[:, None, :]
            out_ref[...] = jnp.broadcast_to(part, (1, 8, LANES))

    return kernel


def _choose_tile_rows(rows_per_chunk):
    """Largest row-tile in {512,...,8} not exceeding the per-chunk row count."""
    for tr in (512, 256, 128, 64, 32, 16, 8):
        if tr <= rows_per_chunk:
            return tr
    return 8


def _flatten_pad(x, padded_elems):
    """Flatten to 1D (original dtype) and zero-pad, then lane-dense reshape."""
    flat = x.reshape(-1)
    n = flat.shape[0]
    if padded_elems != n:
        flat = jnp.pad(flat, (0, padded_elems - n))
    return flat.reshape(padded_elems // LANES, LANES)


def _launch(kernel, inputs):
    """Run the tiled accumulating reduction over lane-dense slabs of `inputs`."""
    n_elems = int(inputs[0].size)
    rows = -(-n_elems // LANES)                               # ceil
    tile_r = _choose_tile_rows(max(8, -(-rows // P_CHUNKS)))
    tiles_per_chunk = -(-rows // (P_CHUNKS * tile_r))
    padded_rows = P_CHUNKS * tiles_per_chunk * tile_r
    padded_elems = padded_rows * LANES

    slabs = [_flatten_pad(a, padded_elems) for a in inputs]

    in_spec = pl.BlockSpec(
        (tile_r, LANES), lambda p, i: (p * tiles_per_chunk + i, 0))
    out_spec = pl.BlockSpec((1, 8, LANES), lambda p, i: (p, 0, 0))

    out = pl.pallas_call(
        kernel,
        out_shape=jax.ShapeDtypeStruct((P_CHUNKS, 8, LANES), jnp.float32),
        grid_spec=pltpu.PrefetchScalarGridSpec(
            num_scalar_prefetch=0,
            grid=(P_CHUNKS, tiles_per_chunk),
            in_specs=[in_spec] * len(slabs),
            out_specs=out_spec,
            scratch_shapes=[pltpu.VMEM((1, LANES), jnp.float32)],
        ),
        compiler_params=pltpu.CompilerParams(
            dimension_semantics=("parallel", "arbitrary")),
    )(*slabs)

    # Tiny final cross-lane reduce of the per-chunk partial sums.
    return jnp.sum(out)


def intermediate_supervision_loss(x, target):
    """Mirrors IntermediateSupervisionWrapper.forward (criterion=SmoothL1, mean)."""
    n_elems = int(target.size)
    scale = 1.0 / (8.0 * n_elems)   # mean divisor folded into the final grid step
    if isinstance(x, tuple):
        c1, c2, c3 = x
        del c3  # reference module never feeds c3 to the criterion -> never DMA it
        kernel = _make_tuple_kernel(A0, A1 + A2, scale)
        return _launch(kernel, [c1, c2, target])
    kernel = _make_single_kernel(scale)
    return _launch(kernel, [x, target])


def _reference(x, target):
    """Pure-JAX reference for correctness check."""
    def crit(p, t):
        d = p.astype(jnp.float32) - t.astype(jnp.float32)
        ad = jnp.abs(d)
        return jnp.mean(jnp.where(ad < 1.0, 0.5 * d * d, ad - 0.5))

    if isinstance(x, tuple):
        c1, c2, _ = x
        return A0 * crit(c1, target) + A1 * crit(c2, target) + A2 * crit(c2, target)
    return crit(x, target)


if __name__ == "__main__":
    key = jax.random.PRNGKey(0)
    k1, k2, k3, kt = jax.random.split(key, 4)

    # --- main test: NCHW (2, 4, 16, 16), tuple and single paths -------------
    shape = (2, 4, 16, 16)
    c1 = jax.random.normal(k1, shape, dtype=jnp.float32) * 2.0
    c2 = jax.random.normal(k2, shape, dtype=jnp.float32) * 2.0
    c3 = jax.random.normal(k3, shape, dtype=jnp.float32) * 2.0
    target = jax.random.normal(kt, shape, dtype=jnp.float32) * 2.0

    loss_tuple = intermediate_supervision_loss((c1, c2, c3), target)
    jax.block_until_ready(loss_tuple)
    ref_tuple = _reference((c1, c2, c3), target)
    assert jnp.allclose(loss_tuple, ref_tuple, rtol=1e-5, atol=1e-5), (loss_tuple, ref_tuple)

    loss_single = intermediate_supervision_loss(c1, target)
    jax.block_until_ready(loss_single)
    ref_single = _reference(c1, target)
    assert jnp.allclose(loss_single, ref_single, rtol=1e-5, atol=1e-5), (loss_single, ref_single)

    # --- ragged shape: exercises the zero-padding / partial-tile path -------
    shape2 = (1, 3, 11, 23)
    d1 = jax.random.normal(k1, shape2, dtype=jnp.float32) * 3.0
    d2 = jax.random.normal(k2, shape2, dtype=jnp.float32) * 3.0
    d3 = jax.random.normal(k3, shape2, dtype=jnp.float32) * 3.0
    t2 = jax.random.normal(kt, shape2, dtype=jnp.float32) * 3.0
    loss_pad = intermediate_supervision_loss((d1, d2, d3), t2)
    jax.block_until_ready(loss_pad)
    ref_pad = _reference((d1, d2, d3), t2)
    assert jnp.allclose(loss_pad, ref_pad, rtol=1e-5, atol=1e-5), (loss_pad, ref_pad)

    print("KERNEL_OK")
</pallas_src>

<mosaic_0001>
module attributes {stable_mosaic.version = 11 : i64} {
  func.func @kernel(%arg0: i32, %arg1: i32, %arg2: memref<8x128xf32, #tpu.memory_space<vmem>>, %arg3: memref<8x128xf32, #tpu.memory_space<vmem>>, %arg4: memref<8x128xf32, #tpu.memory_space<vmem>>, %arg5: memref<1x8x128xf32, #tpu.memory_space<vmem>>, %arg6: memref<1x128xf32, #tpu.memory_space<vmem>>) attributes {dimension_semantics = [#tpu.dimension_semantics<parallel>, #tpu.dimension_semantics<arbitrary>], iteration_bounds = array<i64: 2, 1>, scalar_prefetch = 0 : i64, scratch_operands = 1 : i64, tpu.core_type = #tpu.core_type<tc>, window_params = [{transform_indices = @transform_0, window_bounds = array<i64: 8, 128>}, {transform_indices = @transform_1, window_bounds = array<i64: 8, 128>}, {transform_indices = @transform_2, window_bounds = array<i64: 8, 128>}, {transform_indices = @transform_3, window_bounds = array<i64: 1, 8, 128>}]} {
    %c0_i32 = arith.constant 0 : i32
    %0 = arith.cmpi eq, %arg1, %c0_i32 : i32
    %1 = arith.extui %0 : i1 to i32
    %c0_i32_0 = arith.constant 0 : i32
    %2 = arith.cmpi ne, %1, %c0_i32_0 : i32
    scf.if %2 {
      %cst_20 = arith.constant 0.000000e+00 : f32
      %39 = vector.broadcast %cst_20 : f32 to vector<1x128xf32>
      %c0_21 = arith.constant 0 : index
      %c0_22 = arith.constant 0 : index
      %40 = vector.load %arg6[%c0_21, %c0_22] : memref<1x128xf32, #tpu.memory_space<vmem>>, vector<1x128xf32>
      tpu.vector_store %arg6[%c0_21, %c0_22], %39 {strides = array<i32>} : memref<1x128xf32, #tpu.memory_space<vmem>>, vector<1x128xf32>,
    } else {
    }
    %c0 = arith.constant 0 : index
    %c0_1 = arith.constant 0 : index
    %3 = vector.load %arg4[%c0, %c0_1] : memref<8x128xf32, #tpu.memory_space<vmem>>, vector<8x128xf32>
    %c0_2 = arith.constant 0 : index
    %c0_3 = arith.constant 0 : index
    %4 = vector.load %arg2[%c0_2, %c0_3] : memref<8x128xf32, #tpu.memory_space<vmem>>, vector<8x128xf32>
    %5 = arith.subf %4, %3 : vector<8x128xf32>
    %6 = math.absf %5 : vector<8x128xf32>
    %cst = arith.constant 1.000000e+00 : f32
    %7 = vector.broadcast %cst : f32 to vector<8x128xf32>
    %8 = arith.cmpf olt, %6, %7 : vector<8x128xf32>
    %cst_4 = arith.constant 5.000000e-01 : f32
    %9 = vector.broadcast %cst_4 : f32 to vector<8x128xf32>
    %10 = arith.mulf %9, %5 : vector<8x128xf32>
    %11 = arith.mulf %10, %5 : vector<8x128xf32>
    %cst_5 = arith.constant 5.000000e-01 : f32
    %12 = vector.broadcast %cst_5 : f32 to vector<8x128xf32>
    %13 = arith.subf %6, %12 : vector<8x128xf32>
    %14 = arith.select %8, %11, %13 : vector<8x128xi1>, vector<8x128xf32>
    %c0_6 = arith.constant 0 : index
    %c0_7 = arith.constant 0 : index
    %15 = vector.load %arg3[%c0_6, %c0_7] : memref<8x128xf32, #tpu.memory_space<vmem>>, vector<8x128xf32>
    %16 = arith.subf %15, %3 : vector<8x128xf32>
    %17 = math.absf %16 : vector<8x128xf32>
    %cst_8 = arith.constant 1.000000e+00 : f32
    %18 = vector.broadcast %cst_8 : f32 to vector<8x128xf32>
    %19 = arith.cmpf olt, %17, %18 : vector<8x128xf32>
    %cst_9 = arith.constant 5.000000e-01 : f32
    %20 = vector.broadcast %cst_9 : f32 to vector<8x128xf32>
    %21 = arith.mulf %20, %16 : vector<8x128xf32>
    %22 = arith.mulf %21, %16 : vector<8x128xf32>
    %cst_10 = arith.constant 5.000000e-01 : f32
    %23 = vector.broadcast %cst_10 : f32 to vector<8x128xf32>
    %24 = arith.subf %17, %23 : vector<8x128xf32>
    %25 = arith.select %19, %22, %24 : vector<8x128xi1>, vector<8x128xf32>
    %cst_11 = arith.constant 0.379049033 : f32
    %26 = vector.broadcast %cst_11 : f32 to vector<8x128xf32>
    %27 = arith.mulf %26, %14 : vector<8x128xf32>
    %cst_12 = arith.constant 1.28876662 : f32
    %28 = vector.broadcast %cst_12 : f32 to vector<8x128xf32>
    %29 = arith.mulf %28, %25 : vector<8x128xf32>
    %30 = arith.addf %27, %29 : vector<8x128xf32>
    %c0_13 = arith.constant 0 : index
    %c0_14 = arith.constant 0 : index
    %31 = vector.load %arg6[%c0_13, %c0_14] : memref<1x128xf32, #tpu.memory_space<vmem>>, vector<1x128xf32>
    %cst_15 = arith.constant dense<0.000000e+00> : vector<128xf32>
    %32 = vector.multi_reduction <add>, %30, %cst_15 [0] : vector<8x128xf32> to vector<128xf32>
    %33 = vector.shape_cast %32 : vector<128xf32> to vector<1x128xf32>
    %34 = arith.addf %31, %33 : vector<1x128xf32>
    %c0_16 = arith.constant 0 : index
    %c0_17 = arith.constant 0 : index
    %35 = vector.load %arg6[%c0_16, %c0_17] : memref<1x128xf32, #tpu.memory_space<vmem>>, vector<1x128xf32>
    tpu.vector_store %arg6[%c0_16, %c0_17], %34 {strides = array<i32>} : memref<1x128xf32, #tpu.memory_space<vmem>>, vector<1x128xf32>,
    %c0_i32_18 = arith.constant 0 : i32
    %36 = arith.cmpi eq, %arg1, %c0_i32_18 : i32
    %37 = arith.extui %36 : i1 to i32
    %c0_i32_19 = arith.constant 0 : i32
    %38 = arith.cmpi ne, %37, %c0_i32_19 : i32
    scf.if %38 {
      %c0_20 = arith.constant 0 : index
      %c0_21 = arith.constant 0 : index
      %39 = vector.load %arg6[%c0_20, %c0_21] : memref<1x128xf32, #tpu.memory_space<vmem>>, vector<1x128xf32>
      %cst_22 = arith.constant 6.10351563E-5 : f32
      %40 = vector.broadcast %cst_22 : f32 to vector<1x128xf32>
      %41 = arith.mulf %39, %40 : vector<1x128xf32>
      %42 = vector.shape_cast %41 : vector<1x128xf32> to vector<1x1x128xf32>
      %43 = vector.shape_cast %42 : vector<1x1x128xf32> to vector<1x1x128xf32>
      %44 = vector.broadcast %43 : vector<1x1x128xf32> to vector<1x8x128xf32>
      %c0_23 = arith.constant 0 : index
      %c0_24 = arith.constant 0 : index
      %c0_25 = arith.constant 0 : index
      %45 = vector.load %arg5[%c0_23, %c0_24, %c0_25] : memref<1x8x128xf32, #tpu.memory_space<vmem>>, vector<1x8x128xf32>
      tpu.vector_store %arg5[%c0_23, %c0_24, %c0_25], %44 {strides = array<i32>} : memref<1x8x128xf32, #tpu.memory_space<vmem>>, vector<1x8x128xf32>,
    } else {
    }
    return
  }
  func.func @transform_0(%arg0: i32, %arg1: i32) -> (i32, i32) {
    %c1_i32 = arith.constant 1 : i32
    %0 = arith.muli %arg0, %c1_i32 : i32
    %1 = arith.addi %0, %arg1 : i32
    %c0_i32 = arith.constant 0 : i32
    %c0_i32_0 = arith.constant 0 : i32
    return %1, %c0_i32 : i32, i32
  }
  func.func @transform_1(%arg0: i32, %arg1: i32) -> (i32, i32) {
    %c1_i32 = arith.constant 1 : i32
    %0 = arith.muli %arg0, %c1_i32 : i32
    %1 = arith.addi %0, %arg1 : i32
    %c0_i32 = arith.constant 0 : i32
    %c0_i32_0 = arith.constant 0 : i32
    return %1, %c0_i32 : i32, i32
  }
  func.func @transform_2(%arg0: i32, %arg1: i32) -> (i32, i32) {
    %c1_i32 = arith.constant 1 : i32
    %0 = arith.muli %arg0, %c1_i32 : i32
    %1 = arith.addi %0, %arg1 : i32
    %c0_i32 = arith.constant 0 : i32
    %c0_i32_0 = arith.constant 0 : i32
    return %1, %c0_i32 : i32, i32
  }
  func.func @transform_3(%arg0: i32, %arg1: i32) -> (i32, i32, i32) {
    %c0_i32 = arith.constant 0 : i32
    %c0_i32_0 = arith.constant 0 : i32
    %c0_i32_1 = arith.constant 0 : i32
    return %arg0, %c0_i32, %c0_i32_0 : i32, i32, i32
  }
}

</mosaic_0001>

<bundles_post_ra>
// kernel: tpu_custom_call.1
= control target key start
LH: loop header
LB: loop body
LE: loop exit
PB: predicated region body
PF: predicated region fallthrough
CT: control target
= control target key end

     0   :  { %s1026_s0 = inlined_call_operand.hbm [shape: f32[16,128], index: 0, kind: input, shape index: {}]   ;;  %s1027_s1 = inlined_call_operand.hbm [shape: f32[16,128], index: 1, kind: input, shape index: {}]   ;;  %s1028_s2 = inlined_call_operand.hbm [shape: f32[16,128], index: 2, kind: input, shape index: {}]   ;;  %s1029_s3 = inlined_call_operand.hbm [shape: f32[2,8,128], index: 3, kind: output, shape index: {}]  }
   0x1   :  { %1035 = sst [smem:[#allocation16_spill]] %s1027_s1 }
   0x2   :  { %8 = vsyncpa [#allocation4], 0 }
   0x3   :  { %10 = vsyncpa [#allocation4 + $0x1], 0 }
   0x4   :  { %11 = vsyncpa [#allocation7], 0 }
   0x5   :  { %13 = vsyncpa [#allocation7 + $0x1], 0 }
   0x6   :  { %14 = vsyncpa [#allocation5], 0 }
   0x7   :  { %16 = vsyncpa [#allocation5 + $0x1], 0  ;;  %s762_s12 = smov 0   ;;  %s764_s13 = smov 0  }
   0x8   :  { %s766_s14 = smov 0   ;;  %s768_s15 = smov 0  }
   0x9   :  { %s770_s16 = smov 0   ;;  %s772_s17 = smov 0  }
   0xa LB: > { %1036 = sst [smem:[#allocation13_spill]] %s731_s16  ;;  %s793_s18 = sadd.s32 4294967295, %s735_s17   ;;  %s735_s17 = sphi %s772_s17, %s22_s17   ;;  %s731_s16 = sphi %s770_s16, %s1057_s16   ;;  %s727_s15 = sphi %s768_s15, %s1056_s15   ;;  %s723_s14 = sphi %s766_s14, %s1060_s14   ;;  %s719_s13 = sphi %s764_s13, %s1059_s13   ;;  %s715_s12 = sphi %s762_s12, %s1058_s12  }
   0xb   : > { %s466_s19 = sadd.s32 4294967294, %s735_s17   ;;  %s34_s20 = sadd.s32 1, %s731_s16 }
   0xc   : > { %s43_s21 = sadd.s32 1, %s723_s14  ;;  %p36_p0 = scmp.ge.s32.totalorder %s34_s20, 2 }
   0xd   : > { %p50_p1 = scmp.ne.s32.totalorder %s723_s14, %s719_s13  ;;  %p51_p2 = scmp.eq.s32.totalorder %s735_s17, 0 }
   0xe   : > { %p56_p3 = scmp.ne.s32.totalorder %s719_s13, %s715_s12  ;;  %s1062_s20 = smov (%p36_p0, %s34_s20), 0 }
   0xf   : > { %1037 = sst [smem:[#allocation14_spill]] %s1062_s20  ;;  %p805_p4 = por %p51_p2, %p50_p1 }
  0x10   : > { %p57_p5 = scmp.eq.s32.totalorder %s793_s18, 0  ;;  %s40_s23 = ssub.s32 %s731_s16, %s1062_s20 }
  0x11   : > { %p136_p6 = scmp.eq.s32.totalorder %s793_s18, 1  ;;  %p41_p7 = scmp.eq.s32.totalorder %s40_s23, 0 }
  0x12   : > { %p813_p8 = por %p57_p5, %p56_p3  ;;  %p142_p10 = scmp.eq.s32.totalorder %s466_s19, 1 }
  0x13   : > { %p817_p9 = por %p136_p6, %p50_p1  ;;  %p508_p13 = scmp.lt.s32.totalorder %s735_s17, 2 }
  0x14   : > { %s1039_s24 = scalar_select %p813_p8, 1, 0 }
  0x15   : > { %s1040_s25 = scalar_select %p817_p9, 1, 0 }
  0x16   : > { %s822_s26 = scalar_select %p41_p7, %s723_s14, %s43_s21  }
  0x17   : > { %p824_p11 = por %p142_p10, %p56_p3  ;;  %s162_s28 = sand.u32 1, %s723_s14  }
  0x18   : > { %1041 = sst [smem:[#allocation15_spill]] %s822_s26  ;;  %s833_s29 = sshll.u32 %s162_s28, 3 }
  0x19   : > { %s1042_s27 = scalar_select %p824_p11, 1, 0 }
  0x1a   : > { %s836_s30 = sshll.u32 %s731_s16, 7  ;;  %p840_p0 = pnand %p508_p13, %p805_p4 }
  0x1b   : > { %s181_s5 = sand.u32 1, %s735_s17   ;;  %s1044_s1 = sld [smem:[#allocation16_spill]] }
  0x1c   : > { %s1043_s4 = scalar_select %p840_p0, 1, 0 }
  0x1d   : > { %s185_s9 = scalar_lea.vmem [#allocation6], %s833_s29  ;;  %s856_s11 = scalar_lea.sflag [#allocation7], %s181_s5 }
  0x1e   : > { %s193_s10 = sshll.u32 %s185_s9, 4  ;;  %p862_p4 = pneg %p840_p0  ;;  %s853_s10 = int_to_ptr.vmem [resolvable:$true] %s193_s10 }
  0x21   : > { %s849_s8 = scalar_lea.hbm %s1044_s1, %s836_s30  ;;  %s564_s6 = scalar_lea.hbm %s1044_s1, 256 }
  0x22   : > { %s559_s19 = scalar_lea.hbm %s849_s8, 128  ;;  %p565_p7 = scmp.lt.u32.totalorder %s849_s8, %s1044_s1 }
  0x23   : > { %p560_p3 = scmp.ne.s32.totalorder %s849_s8, %s559_s19  ;;  %p566_p10 = scmp.lt.u32.totalorder %s564_s6, %s559_s19 }
  0x24   : > { %p568_p12 = scmp.lt.u32.totalorder %s559_s19, %s849_s8 }
  0x25   : > { %p562_p5 = pnand %p862_p4, %p560_p3  ;;  %p567_p13 = por %p566_p10, %p565_p7 }
  0x27   : > { %p563_p6 = pneg %p562_p5  ;;  %p569_p1 = por %p568_p12, %p567_p13 }
  0x29   : > { %p570_p2 = pnand %p569_p1, %p563_p6 }
  0x2b   : > { %573 = shalt.err (!%p570_p2)
}
  0x2c   : > { %s574_s5 = scalar_lea.vmem %s853_s10, 128  ;;  %s737_s22 = smov [#allocation6]  }
  0x2d   : > { %p575_p3 = scmp.ne.s32.totalorder %s853_s10, %s574_s5  ;;  %s579_s23 = sshll.u32 %s737_s22, 4  ;;  %s580_s23 = int_to_ptr.vmem [resolvable:$false] %s579_s23 }
  0x2e   : > { %s581_s7 = scalar_lea.vmem %s580_s23, 256  ;;  %p582_p9 = scmp.lt.s32.totalorder %s853_s10, %s580_s23 }
  0x2f   : > { %p577_p5 = pnand %p575_p3, %p862_p4  ;;  %p583_p8 = scmp.lt.s32.totalorder %s581_s7, %s574_s5 }
  0x31   : > { %p578_p11 = pneg %p577_p5  ;;  %p584_p7 = por %p583_p8, %p582_p9 }
  0x33   : > { %p585_p10 = pnand %p584_p7, %p578_p11 }
  0x35   : > { %588 = shalt.err (!%p585_p10)
}
  0x36   : > { %500 = dma.hbm_to_vmem [thread:$0]  (!%p840_p0), %s849_s8, 128, %s853_s10, %s856_s11  }
  0x37   : > { %p1046_p12 = scmp.lt.s32.totalorder %s735_s17, 3  ;;  %p1047_p1 = scmp.ge.s32.totalorder %s735_s17, 1 }
  0x38   : > { %s898_s5 = scalar_lea.hbm %s1026_s0, %s836_s30  ;;  %s166_s22 = scalar_lea.vmem [#allocation3], %s833_s29 }
  0x39   : > { %p890_p2 = pnand %p1047_p1, %p1046_p12  ;;  %s174_s23 = sshll.u32 %s166_s22, 4  ;;  %s901_s23 = int_to_ptr.vmem [resolvable:$true] %s174_s23 }
  0x3a   : > { %s907_s7 = scalar_lea.hbm %s1028_s2, %s836_s30  ;;  %s163_s1 = scalar_lea.sflag [#allocation4], %s162_s28 }
  0x3b   : > { %s1048_s19 = scalar_select %p890_p2, 1, 0 }
  0x3c   : > { %s589_s20 = scalar_lea.hbm %s898_s5, 128  ;;  %s594_s16 = scalar_lea.hbm %s1026_s0, 256 }
  0x3d   : > { %p590_p8 = scmp.ne.s32.totalorder %s898_s5, %s589_s20  ;;  %p595_p6 = scmp.lt.u32.totalorder %s898_s5, %s1026_s0 }
  0x3e   : > { %p596_p13 = scmp.lt.u32.totalorder %s594_s16, %s589_s20  ;;  %p598_p5 = scmp.lt.u32.totalorder %s589_s20, %s898_s5 }
  0x3f   : > { %p592_p9 = pnand %p590_p8, %p862_p4 }
  0x40   : > { %p597_p3 = por %p596_p13, %p595_p6 }
  0x41   : > { %p593_p11 = pneg %p592_p9 }
  0x42   : > { %p599_p7 = por %p598_p5, %p597_p3 }
  0x44   : > { %p600_p10 = pnand %p599_p7, %p593_p11 }
  0x46   : > { %603 = shalt.err (!%p600_p10)
}
  0x47   : > { %s604_s28 = scalar_lea.vmem %s901_s23, 128  ;;  %s738_s30 = smov [#allocation3]  }
  0x48   : > { %p605_p12 = scmp.ne.s32.totalorder %s901_s23, %s604_s28  ;;  %s609_s8 = sshll.u32 %s738_s30, 4  ;;  %s610_s8 = int_to_ptr.vmem [resolvable:$false] %s609_s8 }
  0x49   : > { %s611_s26 = scalar_lea.vmem %s610_s8, 256  ;;  %p612_p9 = scmp.lt.s32.totalorder %s901_s23, %s610_s8 }
  0x4a   : > { %p607_p1 = pnand %p605_p12, %p862_p4  ;;  %p613_p2 = scmp.lt.s32.totalorder %s611_s26, %s604_s28 }
  0x4c   : > { %p608_p8 = pneg %p607_p1  ;;  %p614_p6 = por %p613_p2, %p612_p9 }
  0x4e   : > { %p615_p13 = pnand %p614_p6, %p608_p8 }
  0x50   : > { %618 = shalt.err (!%p615_p13)
}
  0x51   : > { %497 = dma.hbm_to_vmem [thread:$0]  (!%p840_p0), %s898_s5, 128, %s901_s23, %s163_s1  }
  0x52   : > { %s204_s16 = scalar_lea.vmem [#allocation8], %s833_s29  ;;  %s619_s10 = scalar_lea.hbm %s907_s7, 128 }
  0x53   : > { %s212_s20 = sshll.u32 %s204_s16, 4  ;;  %p620_p11 = scmp.ne.s32.totalorder %s907_s7, %s619_s10  ;;  %s213_s20 = int_to_ptr.vmem [resolvable:$true] %s212_s20 }
  0x54   : > { %s624_s22 = scalar_lea.hbm %s1028_s2, 256  ;;  %p625_p5 = scmp.lt.u32.totalorder %s907_s7, %s1028_s2 }
  0x55   : > { %p622_p2 = pnand %p620_p11, %p862_p4  ;;  %p626_p7 = scmp.lt.u32.totalorder %s624_s22, %s619_s10 }
  0x56   : > { %p628_p12 = scmp.lt.u32.totalorder %s619_s10, %s907_s7 }
  0x57   : > { %p623_p3 = pneg %p622_p2  ;;  %p627_p10 = por %p626_p7, %p625_p5 }
  0x59   : > { %p629_p1 = por %p628_p12, %p627_p10 }
  0x5b   : > { %p630_p8 = pnand %p629_p1, %p623_p3 }
  0x5d   : > { %633 = shalt.err (!%p630_p8)
}
  0x5e   : > { %s634_s1 = scalar_lea.vmem %s213_s20, 128  ;;  %s739_s29 = smov [#allocation8]  }
  0x5f   : > { %p635_p9 = scmp.ne.s32.totalorder %s213_s20, %s634_s1  ;;  %s639_s5 = sshll.u32 %s739_s29, 4  ;;  %s640_s5 = int_to_ptr.vmem [resolvable:$false] %s639_s5 }
  0x60   : > { %s641_s23 = scalar_lea.vmem %s640_s5, 256  ;;  %p642_p11 = scmp.lt.s32.totalorder %s213_s20, %s640_s5 }
  0x61   : > { %p637_p6 = pnand %p635_p9, %p862_p4  ;;  %p643_p2 = scmp.lt.s32.totalorder %s641_s23, %s634_s1 }
  0x63   : > { %p638_p13 = pneg %p637_p6  ;;  %p644_p0 = por %p643_p2, %p642_p11 }
  0x65   : > { %p645_p5 = pnand %p644_p0, %p638_p13 }
  0x67   : > { %648 = shalt.err (!%p645_p5)
}
  0x68   : > { %p1049_p7 = scmp.ne.s32.totalorder %s1043_s4, 0  ;;  %p1050_p3 = scmp.ne.s32.totalorder %s1048_s19, 0 }
  0x69   : > { %s954_s21 = sand.u32 (!%p1050_p3), 1, %s719_s13   ;;  %p1051_p0 = scmp.ne.s32.totalorder (!%p1050_p3), %s1039_s24, 0 }
  0x6a   : > { %503 = dma.hbm_to_vmem [thread:$0]  (!%p1049_p7), %s907_s7, 128, %s213_s20, %s856_s11  }
  0x6b   : > { %221 = sbr.rel (%p1050_p3) target bundleno = 172 (0xac), region = 32  ;;  %s957_s8 = sshll.u32 (!%p1050_p3), %s954_s21, 3 }
  0x6c   : > { %s224_s26 = scalar_lea.sflag (!%p1050_p3), [#allocation4], %s954_s21  ;;  %s227_s16 = scalar_lea.vmem (!%p1050_p3), [#allocation3], %s957_s8 }
  0x72   : > { %702 = dma.done.wait (%p1051_p0), %s224_s26, 128  }
  0x73   : > { %704 = vsyncadd (%p1051_p0), %s224_s26, 4294967168  ;;  %s232_s4 = sand.u32 1, %s793_s18   ;;  %s236_s19 = scalar_lea.vmem [#allocation6], %s957_s8 }
  0x74   : > { %s233_s11 = scalar_lea.sflag [#allocation7], %s232_s4 }
  0x75   : > { %706 = dma.done.wait (%p1051_p0), %s233_s11, 256  }
  0x76   : > { %708 = vsyncadd (%p1051_p0), %s233_s11, 4294967040  ;;  %v740_v0 = vmov 0.0   ;;  %s245_s7 = scalar_lea.vmem [#allocation8], %s957_s8  ;;  %v287_v2 = vld [vmem:[%s227_s16] sm:$0xff]  ;;  %v295_v3 = vld [vmem:[%s236_s19] sm:$0xff]  ;;  %v321_v27 = vlaneseq  ;;  %s277_s18 = scalar_lea.vmem [#allocation9], %s957_s8 }
  0x77   : > { %285 = vst [vmem:[#allocation2] sm:$0x1] %v740_v0  ;;  %v286_v1 = vld [vmem:[%s245_s7] sm:$0xff]  ;;  %s341_s24 = sshll.u32 %s277_s18, 4  ;;  %s483_s20 = sshll.u32 %s727_s15, 7  ;;  %s974_s24 = int_to_ptr.vmem [resolvable:$true] %s341_s24 }
  0x78   : > { %v288_v4 = vsub.f32 %v287_v2, %v286_v1  ;;  %v296_v5 = vsub.f32 %v295_v3, %v286_v1  ;;  %v322_v28 = vshrl.u32 %v321_v27, 7  ;;  %s979_s9 = scalar_lea.hbm %s1029_s3, %s483_s20  ;;  %s328_s22 = scalar_lea.sflag [#allocation5], %s954_s21 }
  0x79   : > { %s649_s28 = scalar_lea.vmem %s974_s24, 128  ;;  %p1052_p10 = scmp.ne.s32.totalorder %s1040_s25, 0 }
  0x7a   : > { %v289_v6 = vand.u32 2147483647, %v288_v4  ;;  %v291_v7 = vmul.f32 0.5, %v288_v4  ;;  %v297_v8 = vand.u32 2147483647, %v296_v5  ;;  %v299_v9 = vmul.f32 0.5, %v296_v5  ;;  %p650_p4 = scmp.ne.s32.totalorder %s974_s24, %s649_s28 }
  0x7b   : > { %v323_v29 = vsub.s32 0, %v322_v28  ;;  %s741_s15 = smov [#allocation9]  }
  0x7c   : > { %vm290_vm0 = vcmp.lt.f32.partialorder %v289_v6, 1.0  ;;  %v292_v10 = vmul.f32 %v291_v7, %v288_v4  ;;  %v480_v11 = vadd.f32 -0.5, %v289_v6  ;;  %vm298_vm1 = vcmp.lt.f32.partialorder %v297_v8, 1.0  ;;  %p651_p12 = pnand %p650_p4, %p1052_p10  ;;  %s653_s30 = sshll.u32 %s741_s15, 4  ;;  %s654_s30 = int_to_ptr.vmem [resolvable:$false] %s653_s30 }
  0x7d   : > { %v300_v12 = vmul.f32 %v299_v9, %v296_v5  ;;  %v481_v13 = vadd.f32 -0.5, %v297_v8  ;;  %s655_s1 = scalar_lea.vmem %s654_s30, 256  ;;  %p656_p8 = scmp.lt.s32.totalorder %s974_s24, %s654_s30 }
  0x7e   : > { %v294_v14 = vsel %vm290_vm0, %v292_v10, %v480_v11  ;;  %v306_v24 = vld [vmem:[#allocation2] sm:$0x1]  ;;  %p652_p1 = pneg %p651_p12  ;;  %p657_p9 = scmp.lt.s32.totalorder %s655_s1, %s649_s28 }
  0x7f   : > { %v302_v15 = vsel %vm298_vm1, %v300_v12, %v481_v13  ;;  %v303_v16 = vmul.f32 0.37904903, %v294_v14 }
  0x80   : > { %v304_v17 = vmul.f32 1.2887666, %v302_v15  ;;  %p658_p6 = por %p657_p9, %p656_p8 }
  0x82   : > { %v305_v18 = vadd.f32 %v304_v17, %v303_v16  ;;  %p659_p13 = pnand %p658_p6, %p652_p1 }
  0x84   : > { %v307_v19 = vrot.slane %v305_v18, 4 }
  0x86   : > { %v308_v20 = vadd.f32 %v307_v19, %v305_v18 }
  0x88   : > { %v309_v21 = vrot.slane %v308_v20, 2 }
  0x8a   : > { %v310_v22 = vadd.f32 %v309_v21, %v308_v20 }
  0x8c   : > { %v311_v23 = vrot.slane %v310_v22, 1 }
  0x8e   : > { %v312_v25 = vadd.f32 %v311_v23, %v310_v22 }
  0x90   : > { %v313_v26 = vadd.f32 %v312_v25, %v306_v24 }
  0x92   : > { %314 = vst [vmem:[#allocation2] sm:$0x1] %v313_v26 }
  0x99   : > { %v318_v30 = vld [vmem:[#allocation2] sm:$0x1] }
  0x9a   : > { %v319_v31 = vmul.f32 6.1035156e-05, %v318_v30 }
  0x9c   : > { %v324_v32 = vrot.slane %v319_v31, %v323_v29 }
  0x9e   : > { %326 = vst [vmem:[%s277_s18] sm:$0xff] %v324_v32 }
  0x9f   : > { %662 = shalt.err (!%p659_p13)
}
  0xa0   : > { %s663_s29 = scalar_lea.hbm %s979_s9, 128  ;;  %s667_s21 = scalar_lea.hbm %s1029_s3, 256 }
  0xa1   : > { %p664_p11 = scmp.ne.s32.totalorder %s979_s9, %s663_s29  ;;  %p668_p7 = scmp.lt.u32.totalorder %s979_s9, %s1029_s3 }
  0xa2   : > { %p669_p3 = scmp.lt.u32.totalorder %s667_s21, %s663_s29  ;;  %p671_p4 = scmp.lt.u32.totalorder %s663_s29, %s979_s9 }
  0xa3   : > { %p665_p2 = pnand %p664_p11, %p1052_p10 }
  0xa4   : > { %p670_p0 = por %p669_p3, %p668_p7 }
  0xa5   : > { %p666_p5 = pneg %p665_p2 }
  0xa6   : > { %p672_p12 = por %p671_p4, %p670_p0 }
  0xa8   : > { %p673_p1 = pnand %p672_p12, %p666_p5 }
  0xaa   : > { %676 = shalt.err (!%p673_p1)
}
  0xab   : > { %492 = dma.vmem_to_hbm [thread:$0]  (%p1052_p10), %s974_s24, 128, %s979_s9, %s328_s22  }
  0xac PF: > { %s353_s16 = sand.u32 1, %s715_s12   ;;  %p1053_p8 = scmp.ne.s32.totalorder %s1042_s27, 0 }
  0xad   : > { %p1054_p9 = scmp.ge.s32.totalorder %s735_s17, 2  ;;  %s354_s4 = scalar_lea.sflag [#allocation5], %s353_s16 }
  0xaf   : > { %p505_p6 = pnand %p1054_p9, %p1053_p8 }
  0xb1   : > { %710 = dma.done.wait (!%p505_p6), %s354_s4, 128  }
  0xb2   : > { %712 = vsyncadd (!%p505_p6), %s354_s4, 4294967168  ;;  %s22_s17 = sadd.s32 1, %s735_s17   ;;  %s1055_s25 = sld [smem:[#allocation15_spill]] }
  0xb3   : > { %p19_p13 = scmp.ge.s32.totalorder %s22_s17, 4   ;;  %s1056_s15 = sld [smem:[#allocation13_spill]] }
  0xb4   : > { %s1057_s16 = sld [smem:[#allocation14_spill]]  ;;  %s1058_s12 = smov %s719_s13 }
  0xb5   : > { %s1059_s13 = smov %s723_s14  ;;  %21 = sbr.rel (!%p19_p13) target bundleno = 10 (0xa), region = 109 }
  0xb8   : > { %s1060_s14 = smov %s1055_s25 }
  0xbc   :  { %359 = vsyncpa [#allocation4], 1 }
  0xbd   :  { %361 = vsyncpa [#allocation4 + $0x1], 1 }
  0xbe   :  { %362 = vsyncpa [#allocation7], 1 }
  0xbf   :  { %364 = vsyncpa [#allocation7 + $0x1], 1 }
  0xc0   :  { %365 = vsyncpa [#allocation5], 1 }
  0xc1   :  { %367 = vsyncpa [#allocation5 + $0x1], 1 }

</bundles_post_ra>
